<compile_context>
chip_gen: v7x
topology: tpu7x:2x2x1
jax: 0.10.0
libtpu: 0.0.40
codegen_flags: <defaults>
</compile_context>

<pallas_src>
import functools

import jax
import jax.numpy as jnp
from jax.experimental import pallas as pl
from jax.experimental.pallas import tpu as pltpu


def _round_up(x, m):
    return ((x + m - 1) // m) * m


def _pos_emb_kernel(x_ref, fm_ref, off_ref, o_ref, *, groups):
    """One row-tile of the positional embedding.

    x_ref   : (tn, G)  f32   packed positions (G positions per output row)
    fm_ref  : (G, W)   f32   block-diagonal frequency table, W = G * C
    off_ref : (1, W)   f32   phase offsets (pi/2 on the cos half, 0 on the sin half)
    o_ref   : (tn, W)  out   one lane-dense full-width store per tile
    """
    x = x_ref[...]                      # (tn, G)
    fm = fm_ref[...]                    # (G, W)
    phase = off_ref[...]                # (1, W), broadcasts over rows
    for g in range(groups):             # static unroll; groups is small (<= 64)
        # fm row g is zero outside lanes [g*C, (g+1)*C), so each output lane
        # receives exactly one non-zero multiply-add -> exact f32, pure VPU.
        phase = phase + x[:, g:g + 1] * fm[g:g + 1, :]
    o_ref[...] = jnp.sin(phase).astype(o_ref.dtype)


def positional_embedding(x, num_channels, max_positions=10000, endpoint=False,
                         *, out_dtype=jnp.float32, max_tile_rows=1024,
                         vmem_budget_bytes=8 * 1024 * 1024):
    """x: (N,) positions -> (N, num_channels) embedding (cos half | sin half)."""
    N = x.shape[0]
    H = num_channels // 2
    if H < 1:
        raise ValueError("num_channels must be >= 2")
    denom = H - (1 if endpoint else 0)
    if denom <= 0:
        # torch silently produces NaNs here (0/0); fail loudly instead.
        raise ValueError("endpoint=True requires num_channels >= 4")
    C = 2 * H  # actual output width (== num_channels for even num_channels)

    # ---- parameter-free tables (glue, plain JAX) --------------------------
    freqs = (1.0 / max_positions) ** (jnp.arange(H, dtype=jnp.float32) / denom)
    f_full = jnp.concatenate([freqs, freqs])                               # (C,)
    off_full = jnp.concatenate([jnp.full((H,), jnp.pi / 2, jnp.float32),
                                jnp.zeros((H,), jnp.float32)])             # (C,)

    # ---- lane packing ------------------------------------------------------
    # Make the output block width a multiple of 128 lanes whenever possible.
    if C % 128 == 0:
        G = 1
    elif 128 % C == 0:
        G = 128 // C
    else:
        G = 1  # TODO(synk): lcm-based packing for non power-of-two channel counts
    W = G * C

    # Block-diagonal frequency matrix: fm[g, g*C + c] = f_full[c], else 0.
    fm = (jnp.eye(G, dtype=jnp.float32)[:, :, None]
          * f_full[None, None, :]).reshape(G, W)
    off = jnp.tile(off_full, (G,)).reshape(1, W)

    # ---- tile-size selection ------------------------------------------------
    out_dtype = jnp.dtype(out_dtype)
    row_align = 16 if out_dtype.itemsize < 4 else 8   # bf16 sublane packing
    rows = pl.cdiv(max(N, 1), G)

    # VMEM cap: double-buffered output tile + double-buffered lane-padded x tile.
    per_row_bytes = 2 * W * out_dtype.itemsize + 2 * 128 * 4
    tn = max(row_align,
             (vmem_budget_bytes // per_row_bytes) // row_align * row_align)
    tn = min(tn, max_tile_rows)
    if rows >= 2 * row_align:
        # >= 2 grid steps so the "parallel" axis can shard across v7x's 2 TCs.
        tn = min(tn, _round_up(pl.cdiv(rows, 2), row_align))
    tn = min(tn, _round_up(rows, row_align))   # don't over-pad small N
    tn = max(tn, row_align)

    rows_pad = _round_up(rows, tn)
    n_pad = rows_pad * G

    x_pad = jnp.zeros((n_pad,), jnp.float32).at[:N].set(x.astype(jnp.float32))
    x2d = x_pad.reshape(rows_pad, G)   # packed: x2d[r, g] = position r*G + g

    kernel = functools.partial(_pos_emb_kernel, groups=G)

    out_packed = pl.pallas_call(
        kernel,
        out_shape=jax.ShapeDtypeStruct((rows_pad, W), out_dtype),
        grid=(rows_pad // tn,),
        in_specs=[
            pl.BlockSpec((tn, G), lambda i: (i, 0)),   # packed positions
            pl.BlockSpec((G, W), lambda i: (0, 0)),    # resident freq table
            pl.BlockSpec((1, W), lambda i: (0, 0)),    # resident phase offsets
        ],
        out_specs=pl.BlockSpec((tn, W), lambda i: (i, 0)),
        compiler_params=pltpu.CompilerParams(
            dimension_semantics=("parallel",),
        ),
        cost_estimate=pl.CostEstimate(
            flops=2 * rows_pad * W * G,
            transcendentals=rows_pad * W,
            bytes_accessed=rows_pad * W * out_dtype.itemsize
                           + rows_pad * G * 4 + (G + 1) * W * 4,
        ),
    )(x2d, fm, off)

    # (rows_pad, G*C) row-major is byte-identical to (rows_pad*G, C).
    return out_packed.reshape(n_pad, C)[:N]


def _reference(x, num_channels, max_positions=10000, endpoint=False):
    H = num_channels // 2
    freqs = jnp.arange(H, dtype=jnp.float32)
    freqs = freqs / (H - (1 if endpoint else 0))
    freqs = (1.0 / max_positions) ** freqs
    phase = jnp.outer(x.astype(jnp.float32), freqs)
    return jnp.concatenate([jnp.cos(phase), jnp.sin(phase)], axis=1)


if __name__ == "__main__":
    key = jax.random.PRNGKey(0)
    k1, k2 = jax.random.split(key)

    # Case 1: small C -> packed lane-dense path (C=32, G=4, W=128).
    N1, C1 = 8, 32
    x1 = jax.random.uniform(k1, (N1,), dtype=jnp.float32) * 100.0
    out1 = jax.block_until_ready(positional_embedding(x1, C1))
    ref1 = _reference(x1, C1)
    assert out1.shape == (N1, C1)
    assert jnp.allclose(out1, ref1, atol=1e-4, rtol=1e-4), \
        float(jnp.max(jnp.abs(out1 - ref1)))

    # Case 2: C multiple of 128 (G=1 path), N not a multiple of the tile.
    N2, C2 = 50, 128
    x2 = jax.random.uniform(k2, (N2,), dtype=jnp.float32) * 100.0
    out2 = jax.block_until_ready(positional_embedding(x2, C2, max_tile_rows=16))
    ref2 = _reference(x2, C2)
    assert out2.shape == (N2, C2)
    assert jnp.allclose(out2, ref2, atol=1e-4, rtol=1e-4), \
        float(jnp.max(jnp.abs(out2 - ref2)))

    # Case 3: bf16 store option (halves HBM writeback on v5e/v6e).
    out3 = jax.block_until_ready(
        positional_embedding(x2, C2, out_dtype=jnp.bfloat16))
    assert out3.shape == (N2, C2) and out3.dtype == jnp.bfloat16
    assert jnp.allclose(out3.astype(jnp.float32), ref2, atol=2e-2, rtol=2e-2)

    print("KERNEL_OK")
</pallas_src>

<mosaic_0001>
module attributes {stable_mosaic.version = 11 : i64} {
  func.func @_pos_emb_kernel(%arg0: i32, %arg1: memref<8x4xf32, #tpu.memory_space<vmem>>, %arg2: memref<4x128xf32, #tpu.memory_space<vmem>>, %arg3: memref<1x128xf32, #tpu.memory_space<vmem>>, %arg4: memref<8x128xf32, #tpu.memory_space<vmem>>) attributes {dimension_semantics = [#tpu.dimension_semantics<parallel>], iteration_bounds = array<i64: 1>, scalar_prefetch = 0 : i64, scratch_operands = 0 : i64, tpu.core_type = #tpu.core_type<tc>, window_params = [{transform_indices = @transform_0, window_bounds = array<i64: 8, 4>}, {pipeline_mode = #tpu.pipeline_mode<synchronous>, transform_indices = @transform_1, window_bounds = array<i64: 4, 128>}, {pipeline_mode = #tpu.pipeline_mode<synchronous>, transform_indices = @transform_2, window_bounds = array<i64: 1, 128>}, {transform_indices = @transform_3, window_bounds = array<i64: 8, 128>}]} {
    %c0 = arith.constant 0 : index
    %c0_0 = arith.constant 0 : index
    %0 = vector.load %arg1[%c0, %c0_0] : memref<8x4xf32, #tpu.memory_space<vmem>>, vector<8x4xf32>
    %c0_1 = arith.constant 0 : index
    %c0_2 = arith.constant 0 : index
    %1 = vector.load %arg2[%c0_1, %c0_2] : memref<4x128xf32, #tpu.memory_space<vmem>>, vector<4x128xf32>
    %c0_3 = arith.constant 0 : index
    %c0_4 = arith.constant 0 : index
    %2 = vector.load %arg3[%c0_3, %c0_4] : memref<1x128xf32, #tpu.memory_space<vmem>>, vector<1x128xf32>
    %3 = vector.extract_strided_slice %0 {offsets = [0, 0], sizes = [8, 1], strides = [1, 1]} : vector<8x4xf32> to vector<8x1xf32>
    %4 = vector.extract_strided_slice %1 {offsets = [0, 0], sizes = [1, 128], strides = [1, 1]} : vector<4x128xf32> to vector<1x128xf32>
    %5 = vector.broadcast %3 : vector<8x1xf32> to vector<8x128xf32>
    %6 = vector.broadcast %4 : vector<1x128xf32> to vector<8x128xf32>
    %7 = arith.mulf %5, %6 : vector<8x128xf32>
    %8 = vector.broadcast %2 : vector<1x128xf32> to vector<8x128xf32>
    %9 = arith.addf %8, %7 : vector<8x128xf32>
    %10 = vector.extract_strided_slice %0 {offsets = [0, 1], sizes = [8, 1], strides = [1, 1]} : vector<8x4xf32> to vector<8x1xf32>
    %11 = vector.extract_strided_slice %1 {offsets = [1, 0], sizes = [1, 128], strides = [1, 1]} : vector<4x128xf32> to vector<1x128xf32>
    %12 = vector.broadcast %10 : vector<8x1xf32> to vector<8x128xf32>
    %13 = vector.broadcast %11 : vector<1x128xf32> to vector<8x128xf32>
    %14 = arith.mulf %12, %13 : vector<8x128xf32>
    %15 = arith.addf %9, %14 : vector<8x128xf32>
    %16 = vector.extract_strided_slice %0 {offsets = [0, 2], sizes = [8, 1], strides = [1, 1]} : vector<8x4xf32> to vector<8x1xf32>
    %17 = vector.extract_strided_slice %1 {offsets = [2, 0], sizes = [1, 128], strides = [1, 1]} : vector<4x128xf32> to vector<1x128xf32>
    %18 = vector.broadcast %16 : vector<8x1xf32> to vector<8x128xf32>
    %19 = vector.broadcast %17 : vector<1x128xf32> to vector<8x128xf32>
    %20 = arith.mulf %18, %19 : vector<8x128xf32>
    %21 = arith.addf %15, %20 : vector<8x128xf32>
    %22 = vector.extract_strided_slice %0 {offsets = [0, 3], sizes = [8, 1], strides = [1, 1]} : vector<8x4xf32> to vector<8x1xf32>
    %23 = vector.extract_strided_slice %1 {offsets = [3, 0], sizes = [1, 128], strides = [1, 1]} : vector<4x128xf32> to vector<1x128xf32>
    %24 = vector.broadcast %22 : vector<8x1xf32> to vector<8x128xf32>
    %25 = vector.broadcast %23 : vector<1x128xf32> to vector<8x128xf32>
    %26 = arith.mulf %24, %25 : vector<8x128xf32>
    %27 = arith.addf %21, %26 : vector<8x128xf32>
    %28 = math.sin %27 : vector<8x128xf32>
    %c0_5 = arith.constant 0 : index
    %c0_6 = arith.constant 0 : index
    %29 = vector.load %arg4[%c0_5, %c0_6] : memref<8x128xf32, #tpu.memory_space<vmem>>, vector<8x128xf32>
    tpu.vector_store %arg4[%c0_5, %c0_6], %28 {strides = array<i32>} : memref<8x128xf32, #tpu.memory_space<vmem>>, vector<8x128xf32>,
    return
  }
  func.func @transform_0(%arg0: i32) -> (i32, i32) {
    %c0_i32 = arith.constant 0 : i32
    %c0_i32_0 = arith.constant 0 : i32
    return %arg0, %c0_i32 : i32, i32
  }
  func.func @transform_1(%arg0: i32) -> (i32, i32) {
    %c0_i32 = arith.constant 0 : i32
    %c0_i32_0 = arith.constant 0 : i32
    %c0_i32_1 = arith.constant 0 : i32
    return %c0_i32, %c0_i32_0 : i32, i32
  }
  func.func @transform_2(%arg0: i32) -> (i32, i32) {
    %c0_i32 = arith.constant 0 : i32
    %c0_i32_0 = arith.constant 0 : i32
    %c0_i32_1 = arith.constant 0 : i32
    return %c0_i32, %c0_i32_0 : i32, i32
  }
  func.func @transform_3(%arg0: i32) -> (i32, i32) {
    %c0_i32 = arith.constant 0 : i32
    %c0_i32_0 = arith.constant 0 : i32
    return %arg0, %c0_i32 : i32, i32
  }
}

</mosaic_0001>

<bundles_post_ra>
// kernel: tpu_custom_call.1
= control target key start
LH: loop header
LB: loop body
LE: loop exit
PB: predicated region body
PF: predicated region fallthrough
CT: control target
= control target key end

     0   :  { %v237_v1 = vmov 0   ;;  %v238_v2 = vmov 2   ;;  %s310_s0 = inlined_call_operand.vmem [shape: f32[8,4], index: 0, kind: input, shape index: {}]   ;;  %s311_s1 = inlined_call_operand.vmem [shape: f32[4,128], index: 1, kind: input, shape index: {}]   ;;  %s312_s2 = inlined_call_operand.vmem [shape: f32[1,128], index: 2, kind: input, shape index: {}]   ;;  %s313_s3 = inlined_call_operand.hbm [shape: f32[8,128], index: 3, kind: output, shape index: {}]  }
   0x1   :  { %v15_v0 = vld [vmem:[%s310_s0] sm:$0xff]  ;;  %204 = vset.pattern.permute.xlu0 %v237_v1  ;;  %206 = vset.pattern.permute.xlu1 %v238_v2 }
   0x2   :  { %8 = vsyncpa [#allocation3], 0  ;;  %20 = vperm.xlu0 %204, %v15_v0   ;;  %46 = vperm.xlu1 %206, %v15_v0   ;;  %v239_v3 = vmov 1   ;;  %v240_v4 = vmov 3   ;;  %v23_v5 = vlaneseq  ;;  %v16_v8 = vld [vmem:[%s311_s1] sm:$0xf] }
   0x3   :  { %v184_v17 = vld [vmem:[%s312_s2] ss:$0 sm:$0xff]  ;;  %v241_v40 = vmov 2102212464   ;;  %v242_v42 = vmov 920167782  }
   0x4   :  { %v24_v6 = vshrl.u32 %v23_v5, 7  ;;  %v243_v46 = vmov 1326507024   ;;  %v244_v48 = vmov 683565275   ;;  %s247_s1 = smov [#allocation2]  }
   0x5   :  { %v245_v50 = vmov 2475754826   ;;  %v246_v53 = vmov 2131351028   ;;  %s176_s2 = sshll.u32 %s247_s1, 4  ;;  %s177_s2 = int_to_ptr.vmem [resolvable:$true] %s176_s2 }
   0x6   :  { %205 = vset.pattern.permute.xlu0 %v239_v3  ;;  %207 = vset.pattern.permute.xlu1 %v240_v4  ;;  %v25_v7 = vsub.s32 0, %v24_v6  ;;  %v41_v10 = vsub.s32 1, %v24_v6  ;;  %v51_v12 = vsub.s32 2, %v24_v6  ;;  %v61_v14 = vsub.s32 3, %v24_v6  ;;  %s213_s17 = scalar_lea.vmem %s177_s2, 128  ;;  %p218_p1 = scmp.lt.s32.totalorder %s177_s2, %s177_s2 }
   0x7   :  { %36 = vperm.xlu0 %205, %v15_v0   ;;  %56 = vperm.xlu1 %207, %v15_v0   ;;  %p214_p0 = scmp.ne.s32.totalorder %s177_s2, %s213_s17  ;;  %p219_p2 = scmp.lt.s32.totalorder %s213_s17, %s213_s17 }
   0x8   :  { %v26_v9 = vrot.slane %v16_v8, %v25_v7  ;;  %v42_v16 = vrot.slane %v16_v8, %v41_v10  ;;  %v52_v18 = vrot.slane %v16_v8, %v51_v12  ;;  %v62_v19 = vrot.slane %v16_v8, %v61_v14 }
   0x9   :  { %p220_p3 = por %p219_p2, %p218_p1 }
   0xb   :  { %208 = vset.pattern.permute.xlu0 %v240_v4  ;;  %p221_p4 = pnand %p220_p3, %p214_p0 }
  0x81   :  { %v21_v11 = vpop.permute.xlu0 %20  ;;  %v47_v13 = vpop.permute.xlu1 %46 }
  0x82   :  { %v27_v15 = vmul.f32 %v26_v9, %v21_v11  ;;  %v53_v24 = vmul.f32 %v52_v18, %v47_v13 }
  0x84   :  { %v34_v22 = vadd.f32 %v184_v17, %v27_v15 }
  0x86   :  { %v37_v20 = vpop.permute.xlu0 %36  ;;  %v57_v21 = vpop.permute.xlu1 %56 }
  0x87   :  { %v43_v23 = vmul.f32 %v42_v16, %v37_v20  ;;  %v63_v26 = vmul.f32 %v62_v19, %v57_v21 }
  0x89   :  { %v44_v25 = vadd.f32 %v43_v23, %v34_v22 }
  0x8b   :  { %v54_v27 = vadd.f32 %v53_v24, %v44_v25 }
  0x8d   :  { %v277_v28 = vadd.f32 %v63_v26, %v54_v27 }
  0x8f   :  { %v68_v29 = vand.u32 2139095040, %v277_v28  ;;  %v65_v30 = vand.u32 2147483647, %v277_v28  ;;  %vm67_vm7 = vcmp.lt.s32.totalorder %v277_v28, 0  ;;  %vm157_vm12 = vweird.f32 %v277_v28 }
  0x91   :  { %v69_v31 = vshrl.u32 %v68_v29, 23  ;;  %v72_v33 = vand.u32 8388607, %v65_v30  ;;  %vm66_vm8 = vcmp.le.f32.partialorder %v65_v30, 0.7853982 }
  0x93   :  { %v185_v32 = vadd.s32 4294967169, %v69_v31  ;;  %v73_v36 = vor.u32 8388608, %v72_v33 }
  0x95   :  { %v75_v34 = vadd.s32 1, %v185_v32  ;;  %v113_v44 = vshll.u32 %v73_v36, 8 }
  0x97   :  { %vm76_vm0 = vcmp.gt.s32.totalorder %v75_v34, 0 }
  0x98   :  { %v77_v35 = vsel %vm76_vm0, %v75_v34, 0 }
  0x99   :  { %v79_v37 = vand.u32 31, %v77_v35  ;;  %v78_v38 = vshrl.u32 %v77_v35, 5 }
  0x9b   :  { %v80_v39 = vsub.s32 32, %v79_v37  ;;  %v91_v41 = vshll.u32 %v241_v40, %v79_v37  ;;  %v94_v43 = vshll.u32 %v242_v42, %v79_v37  ;;  %v82_v49 = vshll.u32 %v244_v48, %v79_v37 }
  0x9c   :  { %v85_v52 = vshll.u32 %v245_v50, %v79_v37  ;;  %v88_v55 = vshll.u32 %v246_v53, %v79_v37  ;;  %vm100_vm1 = vcmp.lt.s32.totalorder %v78_v38, 4  ;;  %vm97_vm2 = vcmp.lt.s32.totalorder %v78_v38, 1 }
  0x9d   :  { %v92_v45 = vshrl.u32 %v242_v42, %v80_v39  ;;  %v95_v47 = vshrl.u32 %v243_v46, %v80_v39  ;;  %v83_v51 = vshrl.u32 %v245_v50, %v80_v39  ;;  %v86_v54 = vshrl.u32 %v246_v53, %v80_v39 }
  0x9e   :  { %v89_v56 = vshrl.u32 %v241_v40, %v80_v39  ;;  %v81_v60 = vshrl.u32 %v244_v48, %v80_v39  ;;  %vm98_vm3 = vcmp.lt.s32.totalorder %v78_v38, 2  ;;  %vm99_vm4 = vcmp.lt.s32.totalorder %v78_v38, 3 }
  0x9f   :  { %v93_v57 = vor.u32 %v92_v45, %v91_v41  ;;  %v96_v58 = vor.u32 %v95_v47, %v94_v43  ;;  %v84_v59 = vor.u32 %v83_v51, %v82_v49  ;;  %v87_v61 = vor.u32 %v86_v54, %v85_v52 }
  0xa0   :  { %v90_v62 = vor.u32 %v89_v56, %v88_v55 }
  0xa1   :  { %v106_v63 = vsel %vm100_vm1, %v93_v57, 920167782  ;;  %v110_v0 = vsel %vm100_vm1, %v96_v58, 1326507024  ;;  %v105_v2 = vsel %vm97_vm2, %v84_v59, %v87_v61  ;;  %v101_v5 = vsel %vm97_vm2, %v81_v60, %v84_v59 }
  0xa2   :  { %v102_v1 = vsel %vm100_vm1, %v90_v62, 2102212464  ;;  %v107_v3 = vsel %vm99_vm4, %v90_v62, %v106_v63  ;;  %v109_v4 = vsel %vm97_vm2, %v87_v61, %v90_v62  ;;  %v111_v8 = vsel %vm99_vm4, %v93_v57, %v110_v0 }
  0xa3   :  { %v103_v6 = vsel %vm99_vm4, %v87_v61, %v102_v1  ;;  %v108_v7 = vsel %vm98_vm3, %v105_v2, %v107_v3  ;;  %v112_v9 = vsel %vm98_vm3, %v109_v4, %v111_v8 }
  0xa4   :  { %v283_v10 = vmul.u32.u64.low %v113_v44, %v108_v7  ;;  %v284_v11 = vmul.u32.u64.high %v113_v44, %v108_v7, %v283_v10  ;;  %v286_v12 = vmul.u32.u64.low %v113_v44, %v112_v9  ;;  %v287_v13 = vmul.u32.u64.high %v113_v44, %v112_v9, %v286_v12 }
  0xa5   :  { %v104_v14 = vsel %vm98_vm3, %v101_v5, %v103_v6 }
  0xa6   :  { %v123_v15 = vadd.s32 1, %v284_v11  ;;  %v120_v16 = vmul.u32 %v113_v44, %v104_v14  ;;  %vm122_vm5 = vc.u32 %v287_v13, %v283_v10  ;;  %v121_v29 = vadd.s32 %v283_v10, %v287_v13 }
  0xa8   :  { %v124_v17 = vsel %vm122_vm5, %v123_v15, %v284_v11 }
  0xa9   :  { %v125_v18 = vadd.s32 %v124_v17, %v120_v16 }
  0xab   :  { %v126_v19 = vadd.s32 536870912, %v125_v18 }
  0xad   :  { %v127_v20 = vshrl.u32 %v126_v19, 30 }
  0xaf   :  { %v128_v21 = vshll.u32 %v127_v20, 30  ;;  %v151_v42 = vsub.s32 4, %v127_v20 }
  0xb1   :  { %v129_v22 = vsub.s32 %v125_v18, %v128_v21  ;;  %v152_v45 = vsel %vm67_vm7, %v151_v42, %v127_v20 }
  0xb2   :  { %v154_v47 = vsel %vm66_vm8, 0, %v152_v45 }
  0xb3   :  { %v131_v23 = vsub.s32 0, %v129_v22  ;;  %v158_v48 = vadd.s32 3, %v154_v47 }
  0xb5   :  { %v186_v24 = vmin.u32 %v131_v23, %v129_v22  ;;  %v159_v49 = vand.u32 3, %v158_v48 }
  0xb7   :  { %v133_v25 = vclz %v186_v24  ;;  %vm164_vm9 = vcmp.eq.s32.totalorder %v159_v49, 2  ;;  %vm161_vm10 = vcmp.eq.s32.totalorder %v159_v49, 0  ;;  %vm160_vm11 = vcmp.lt.s32.totalorder %v159_v49, 2 }
  0xb9   :  { %v187_v26 = vadd.s32 4294967294, %v133_v25 }
  0xbb   :  { %vm188_vm6 = vcmp.lt.s32.totalorder %v187_v26, 0 }
  0xbc   :  { %v136_v27 = vsel %vm188_vm6, 0, %v187_v26 }
  0xbd   :  { %v137_v31 = vsub.s32 32, %v136_v27  ;;  %v141_v32 = vsub.s32 4294967266, %v136_v27  ;;  %v138_v33 = vshll.u32 %v129_v22, %v136_v27 }
  0xbf   :  { %v139_v34 = vshrl.u32 %v121_v29, %v137_v31  ;;  %v142_v35 = vadd.s32 127, %v141_v32 }
  0xc1   :  { %v140_v36 = vor.u32 %v139_v34, %v138_v33  ;;  %v143_v37 = vshll.u32 %v142_v35, 23 }
  0xc3   :  { %v144_v38 = vor.u32 4788187, %v143_v37  ;;  %v147_v40 = vcvt.s32.f32 %v140_v36 }
  0xc5   :  { %v145_v39 = vand.u32 2147483647, %v144_v38 }
  0xc7   :  { %v148_v41 = vmul.f32 %v147_v40, %v145_v39 }
  0xc9   :  { %v149_v43 = vxor.u32 2147483648, %v148_v41 }
  0xcb   :  { %v150_v44 = vsel %vm67_vm7, %v149_v43, %v148_v41 }
  0xcc   :  { %v153_v46 = vsel %vm66_vm8, %v277_v28, %v150_v44 }
  0xcd   :  { %209 = vcosq.f32 %v153_v46 }
  0xce   :  { %211 = vsinq.f32 %v153_v46 }
  0xd7   :  { %v210_v50 = vpop.eup %209 }
  0xd8   :  { %v212_v51 = vpop.eup %211  ;;  %v165_v52 = vxor.u32 2147483648, %v210_v50 }
  0xd9   :  { %v162_v53 = vxor.u32 2147483648, %v212_v51 }
  0xda   :  { %v166_v54 = vsel %vm164_vm9, %v165_v52, %v212_v51 }
  0xdb   :  { %v163_v30 = vsel %vm161_vm10, %v210_v50, %v162_v53 }
  0xdc   :  { %v167_v55 = vsel %vm160_vm11, %v163_v30, %v166_v54 }
  0xdd   :  { %v168_v56 = vsel %vm157_vm12, nan, %v167_v55 }
  0xde   :  { %169 = vst [vmem:[#allocation2] sm:$0xff] %v168_v56 }
  0xdf   :  { %224 = shalt.err (!%p221_p4)
}
  0xe0   :  { %s225_s20 = scalar_lea.hbm %s313_s3, 128 }
  0xe1   :  { %p226_p5 = scmp.ne.s32.totalorder %s313_s3, %s225_s20  ;;  %p229_p6 = scmp.lt.u32.totalorder %s225_s20, %s313_s3 }
  0xe3   :  { %p231_p7 = pnand %p229_p6, %p226_p5 }
  0xe5   :  { %234 = shalt.err (!%p231_p7)
}
  0xe6   :  { %179 = dma.vmem_to_hbm [thread:$0]  %s177_s2, 128, %s313_s3, [#allocation3]  }
  0xe7   :  { %235 = dma.done.wait [#allocation3], 128  }
  0xe8   :  { %236 = vsyncadd [#allocation3], 4294967168 }
  0xe9   :  { %183 = vsyncpa [#allocation3], 1 }

</bundles_post_ra>
